<compile_context>
chip_gen: v7x
topology: tpu7x:2x2x1
jax: 0.10.0
libtpu: 0.0.40
codegen_flags: <defaults>
</compile_context>

<pallas_src>
import math

import jax
import jax.numpy as jnp
from jax.experimental import pallas as pl
from jax.experimental.pallas import tpu as pltpu


_VMEM_LIMIT = 48 * 1024 * 1024  # fits v7x (64 MiB) with headroom; fine on v5e/v6e


def _cparams(sem):
    return pltpu.CompilerParams(dimension_semantics=sem,
                                vmem_limit_bytes=_VMEM_LIMIT)


def _pick_tile(dim, pref, align):
    """Largest tile <= pref that divides `dim` and is a multiple of `align`;
    falls back to the full dimension (whole-axis block)."""
    if dim <= pref:
        return dim
    t = (pref // align) * align
    while t >= align:
        if dim % t == 0:
            return t
        t -= align
    return dim


def _pick_bh_tile(bh, tk, dh, itemsize):
    budget = 4 * 1024 * 1024              # K+V bytes per pipelined buffer
    per_bh = max(1, 2 * tk * dh * itemsize)
    pref = max(8, budget // per_bh)
    return _pick_tile(bh, pref, 8)


# --------------------------- tiled matmul -----------------------------------

def _matmul_kernel(a_ref, b_ref, o_ref, acc_ref):
    @pl.when(pl.program_id(2) == 0)
    def _init():
        acc_ref[...] = jnp.zeros_like(acc_ref)

    acc_ref[...] += jnp.dot(a_ref[...], b_ref[...],
                            preferred_element_type=jnp.float32)

    @pl.when(pl.program_id(2) == pl.num_programs(2) - 1)
    def _fin():
        o_ref[...] = acc_ref[...].astype(o_ref.dtype)


def pallas_matmul(a, b, out_dtype=jnp.float32):
    M, K = a.shape
    K2, N = b.shape
    assert K == K2
    tm = _pick_tile(M, 256, 8)
    tn = _pick_tile(N, 256, 128)
    tk = _pick_tile(K, 512, 128)
    grid = (M // tm, N // tn, K // tk)
    return pl.pallas_call(
        _matmul_kernel,
        grid=grid,
        in_specs=[pl.BlockSpec((tm, tk), lambda i, j, k: (i, k)),
                  pl.BlockSpec((tk, tn), lambda i, j, k: (k, j))],
        out_specs=pl.BlockSpec((tm, tn), lambda i, j, k: (i, j)),
        out_shape=jax.ShapeDtypeStruct((M, N), out_dtype),
        scratch_shapes=[pltpu.VMEM((tm, tn), jnp.float32)],
        compiler_params=_cparams(("parallel", "parallel", "arbitrary")),
    )(a, b)


# --------------------- fused T5 RMS-norm + projection ------------------------

def _norm_matmul_kernel(x_ref, g_ref, w_ref, o_ref):
    x = x_ref[...].astype(jnp.float32)
    var = jnp.mean(x * x, axis=-1, keepdims=True)        # T5 norm: no mean/bias
    h = x * jax.lax.rsqrt(var + 1e-6) * g_ref[...].astype(jnp.float32)
    o_ref[...] = jnp.dot(h.astype(w_ref.dtype), w_ref[...],
                         preferred_element_type=jnp.float32).astype(o_ref.dtype)


def pallas_norm_matmul(x, gamma, w, out_dtype=jnp.bfloat16):
    M, D = x.shape
    D2, N = w.shape
    assert D == D2
    tn = _pick_tile(N, 512, 128)
    return pl.pallas_call(
        _norm_matmul_kernel,
        grid=(N // tn,),
        in_specs=[pl.BlockSpec((M, D), lambda j: (0, 0)),
                  pl.BlockSpec((1, D), lambda j: (0, 0)),
                  pl.BlockSpec((D, tn), lambda j: (0, j))],
        out_specs=pl.BlockSpec((M, tn), lambda j: (0, j)),
        out_shape=jax.ShapeDtypeStruct((M, N), out_dtype),
        compiler_params=_cparams(("parallel",)),
    )(x, gamma.reshape(1, D), w)


# ----------------- fused RMS-norm + relu-FFN + residual ----------------------

def _norm_ffn_kernel(x_ref, g_ref, wi_ref, wo_ref, o_ref, acc_ref):
    @pl.when(pl.program_id(0) == 0)
    def _init():
        acc_ref[...] = x_ref[...].astype(jnp.float32)     # residual

    x = x_ref[...].astype(jnp.float32)
    var = jnp.mean(x * x, axis=-1, keepdims=True)
    h = x * jax.lax.rsqrt(var + 1e-6) * g_ref[...].astype(jnp.float32)
    a = jnp.dot(h.astype(wi_ref.dtype), wi_ref[...],
                preferred_element_type=jnp.float32)
    a = jnp.maximum(a, 0.0)                               # activation_type='relu'
    acc_ref[...] += jnp.dot(a.astype(wo_ref.dtype), wo_ref[...],
                            preferred_element_type=jnp.float32)

    @pl.when(pl.program_id(0) == pl.num_programs(0) - 1)
    def _fin():
        o_ref[...] = acc_ref[...].astype(o_ref.dtype)


def pallas_norm_ffn(x, gamma, wi, wo, out_dtype=jnp.float32):
    M, D = x.shape
    D2, F = wi.shape
    assert D == D2
    tf = _pick_tile(F, 512, 128)      # stream inter_size in chunks (v7x VMEM)
    return pl.pallas_call(
        _norm_ffn_kernel,
        grid=(F // tf,),
        in_specs=[pl.BlockSpec((M, D), lambda f: (0, 0)),
                  pl.BlockSpec((1, D), lambda f: (0, 0)),
                  pl.BlockSpec((D, tf), lambda f: (0, f)),
                  pl.BlockSpec((tf, D), lambda f: (f, 0))],
        out_specs=pl.BlockSpec((M, D), lambda f: (0, 0)),
        out_shape=jax.ShapeDtypeStruct((M, D), out_dtype),
        scratch_shapes=[pltpu.VMEM((M, D), jnp.float32)],
        compiler_params=_cparams(("arbitrary",)),
    )(x, gamma.reshape(1, D), wi, wo)


# -------------------- single-token (decode) attention ------------------------

def _decode_attn_kernel(q_ref, k_ref, v_ref, bias_ref, o_ref):
    # q: [bh, 1, Dh]; k/v: [bh, Tk, Dh]; bias: [bh, 1, Tk] (f32, mask folded in)
    s = jnp.einsum('bqd,bkd->bqk', q_ref[...], k_ref[...],
                   preferred_element_type=jnp.float32)
    s = s + bias_ref[...]
    m = jnp.max(s, axis=-1, keepdims=True)
    p = jnp.exp(s - m)
    denom = jnp.sum(p, axis=-1, keepdims=True)
    p = p * pl.reciprocal(denom, approx=True)
    o = jnp.einsum('bqk,bkd->bqd', p.astype(v_ref.dtype), v_ref[...],
                   preferred_element_type=jnp.float32)
    o_ref[...] = o.astype(o_ref.dtype)


def pallas_decode_attention(q, k, v, bias, out_dtype=jnp.bfloat16):
    BH, Tq, Dh = q.shape
    Tk = k.shape[1]
    tb = _pick_bh_tile(BH, Tk, Dh, jnp.dtype(k.dtype).itemsize)
    return pl.pallas_call(
        _decode_attn_kernel,
        grid=(BH // tb,),
        in_specs=[pl.BlockSpec((tb, Tq, Dh), lambda b: (b, 0, 0)),
                  pl.BlockSpec((tb, Tk, Dh), lambda b: (b, 0, 0)),
                  pl.BlockSpec((tb, Tk, Dh), lambda b: (b, 0, 0)),
                  pl.BlockSpec((tb, Tq, Tk), lambda b: (b, 0, 0))],
        out_specs=pl.BlockSpec((tb, Tq, Dh), lambda b: (b, 0, 0)),
        out_shape=jax.ShapeDtypeStruct((BH, Tq, Dh), out_dtype),
        compiler_params=_cparams(("parallel",)),
    )(q, k, v, bias)


# --------------------------- T5 greedy decoder --------------------------------

class FTT5DecodingPallas:
    """JAX/Pallas re-implementation of FTT5Decoding.forward (greedy)."""

    def __init__(self, head_num, head_size, inter_size, mem_d_model, d_model,
                 num_layer, start_id, end_id, vocab_size, q_scaling=1.0,
                 num_bucket=32, max_distance=128, t5_with_bias=False,
                 position_embedding_type=0, activation_type='relu',
                 tie_word_embeddings=True, seed=0):
        assert activation_type == 'relu'
        assert position_embedding_type == 0     # relative position bias
        assert not t5_with_bias
        self.head_num = head_num
        self.head_size = head_size
        self.d_model = d_model
        self.start_id = start_id
        self.end_id = end_id
        self.vocab_size = vocab_size
        self.num_bucket = num_bucket
        self.max_distance = max_distance

        inner = head_num * head_size
        qs = jnp.float32(1.0 / q_scaling)       # folded into Q projections
        key = jax.random.PRNGKey(seed)

        def nrm(k, shape, scale=0.02):
            return jax.random.normal(k, shape, dtype=jnp.float32) * scale

        keys = jax.random.split(key, 2 + num_layer)
        self.embed = nrm(keys[0], (vocab_size, d_model), 1.0 / math.sqrt(d_model))
        self.rel_bias = nrm(keys[1], (num_bucket, head_num), 0.1)
        self.final_ln = jnp.ones((d_model,), jnp.float32)
        # tied LM head, pre-transposed and pre-scaled once (hoisted out of the loop)
        lm_scale = d_model ** -0.5 if tie_word_embeddings else 1.0
        self.lm_head = (self.embed.T * lm_scale).astype(jnp.bfloat16)

        self.layers = []
        for li in range(num_layer):
            lk = jax.random.split(keys[2 + li], 10)
            wq = nrm(lk[0], (d_model, inner)) * qs
            wk = nrm(lk[1], (d_model, inner))
            wv = nrm(lk[2], (d_model, inner))
            self.layers.append(dict(
                ln0=jnp.ones((d_model,), jnp.float32),
                wqkv=jnp.concatenate([wq, wk, wv], axis=1).astype(jnp.bfloat16),
                o=nrm(lk[3], (inner, d_model)).astype(jnp.bfloat16),
                ln1=jnp.ones((d_model,), jnp.float32),
                cq=(nrm(lk[4], (d_model, inner)) * qs).astype(jnp.bfloat16),
                ck=nrm(lk[5], (mem_d_model, inner)).astype(jnp.bfloat16),
                cv=nrm(lk[6], (mem_d_model, inner)).astype(jnp.bfloat16),
                co=nrm(lk[7], (inner, d_model)).astype(jnp.bfloat16),
                ln2=jnp.ones((d_model,), jnp.float32),
                wi=nrm(lk[8], (d_model, inter_size)).astype(jnp.bfloat16),
                wo=nrm(lk[9], (inter_size, d_model)).astype(jnp.bfloat16),
            ))

    # ---- helpers ------------------------------------------------------------

    def _relative_position_bucket(self, relative_position):
        # decoder self-attention: bidirectional=False (T5 bucketing)
        num_buckets, max_distance = self.num_bucket, self.max_distance
        rp = -jnp.minimum(relative_position, 0)
        max_exact = num_buckets // 2
        is_small = rp < max_exact
        rp_f = jnp.maximum(rp.astype(jnp.float32), 1.0)
        large = max_exact + (jnp.log(rp_f / max_exact)
                             / math.log(max_distance / max_exact)
                             * (num_buckets - max_exact)).astype(jnp.int32)
        large = jnp.minimum(large, num_buckets - 1)
        return jnp.where(is_small, rp, large)

    # ---- forward (mirrors FTT5Decoding.forward signature) --------------------

    def forward(self, beam_width, max_seq_len, top_k, top_p,
                beam_search_diversity_rate, temperature, len_penalty,
                repetition_penalty, presence_penalty, min_length, random_seed,
                mem_hidden_states, mem_seq_len, is_return_output_log_probs,
                is_return_cum_log_probs, is_return_cross_attentions=False,
                bad_words_list=None, stop_words_list=None):
        # TODO(synk): top_p sampling, beam-search diversity, length/repetition/
        # presence penalties, bad/stop word lists and cross-attention return
        # have no clean Pallas equivalent here; generation is greedy (top_k==1).
        B = mem_hidden_states.shape[0]
        Beff = B * beam_width
        H, Dh = self.head_num, self.head_size
        inner = H * Dh
        BH = Beff * H
        V = self.vocab_size
        D = self.d_model
        end_id = self.end_id
        Tc = max_seq_len                       # KV-cache length (positions 0..Tc-1)

        mem = jnp.repeat(jnp.asarray(mem_hidden_states, jnp.float32),
                         beam_width, axis=0)
        mem_len = jnp.repeat(jnp.asarray(mem_seq_len, jnp.int32),
                             beam_width, axis=0)
        S = mem.shape[1]

        # ---- encoder-side work hoisted out of the decode loop ----------------
        mem2d = mem.reshape(Beff * S, -1).astype(jnp.bfloat16)
        cross_k, cross_v = [], []
        for lyr in self.layers:
            ck = pallas_matmul(mem2d, lyr['ck'], out_dtype=jnp.bfloat16)
            cv = pallas_matmul(mem2d, lyr['cv'], out_dtype=jnp.bfloat16)
            ck = ck.reshape(Beff, S, H, Dh).transpose(0, 2, 1, 3).reshape(BH, S, Dh)
            cv = cv.reshape(Beff, S, H, Dh).transpose(0, 2, 1, 3).reshape(BH, S, Dh)
            cross_k.append(ck)
            cross_v.append(cv)
        cross_k, cross_v = tuple(cross_k), tuple(cross_v)

        # cross-attention mask (built once; small [BH, 1, S])
        cross_mask = jnp.where(jnp.arange(S)[None, :] < mem_len[:, None],
                               0.0, -1e9).astype(jnp.float32)
        cross_bias = jnp.broadcast_to(cross_mask[:, None, :],
                                      (Beff, H, S)).reshape(BH, 1, S)

        # self-attention relative-position bias + causal mask: [H, Tc, Tc] (small)
        ctx = jnp.arange(Tc)[:, None]
        keyp = jnp.arange(Tc)[None, :]
        rel = keyp - ctx
        bucket = self._relative_position_bucket(rel)
        self_bias = (jnp.transpose(self.rel_bias[bucket], (2, 0, 1))
                     + jnp.where(rel > 0, -1e9, 0.0)[None]).astype(jnp.float32)

        # ---- decode loop state ------------------------------------------------
        k0 = tuple(jnp.zeros((BH, Tc, Dh), jnp.bfloat16) for _ in self.layers)
        v0 = tuple(jnp.zeros((BH, Tc, Dh), jnp.bfloat16) for _ in self.layers)
        cur0 = jnp.full((Beff,), self.start_id, jnp.int32)
        fin0 = jnp.zeros((Beff,), jnp.bool_)
        len0 = jnp.full((Beff,), max_seq_len, jnp.int32)

        def step(carry, t):
            cur_tok, finished, seq_len, k_caches, v_caches = carry
            x = jnp.take(self.embed, cur_tok, axis=0)        # [Beff, D] f32

            # per-step self-attention bias row: [BH, 1, Tc]
            bias_row = jax.lax.dynamic_slice_in_dim(self_bias, t, 1, axis=1)
            self_bias_t = jnp.broadcast_to(bias_row[None, :, 0, :],
                                           (Beff, H, Tc)).reshape(BH, 1, Tc)

            new_k, new_v = [], []
            for li, lyr in enumerate(self.layers):
                # ---- self attention (fused norm + concat QKV projection) -----
                qkv = pallas_norm_matmul(x, lyr['ln0'], lyr['wqkv'],
                                         out_dtype=jnp.bfloat16)
                q, k_new, v_new = jnp.split(qkv, 3, axis=-1)
                q = q.reshape(BH, 1, Dh)
                kc = jax.lax.dynamic_update_slice(
                    k_caches[li], k_new.reshape(BH, 1, Dh), (0, t, 0))
                vc = jax.lax.dynamic_update_slice(
                    v_caches[li], v_new.reshape(BH, 1, Dh), (0, t, 0))
                new_k.append(kc)
                new_v.append(vc)
                a = pallas_decode_attention(q, kc, vc, self_bias_t)
                x = x + pallas_matmul(a.reshape(Beff, inner), lyr['o'],
                                      out_dtype=jnp.float32)

                # ---- cross attention (K/V precomputed outside the scan) -------
                qc = pallas_norm_matmul(x, lyr['ln1'], lyr['cq'],
                                        out_dtype=jnp.bfloat16).reshape(BH, 1, Dh)
                ac = pallas_decode_attention(qc, cross_k[li], cross_v[li],
                                             cross_bias)
                x = x + pallas_matmul(ac.reshape(Beff, inner), lyr['co'],
                                      out_dtype=jnp.float32)

                # ---- FFN (fused norm + relu FFN + residual) -------------------
                x = pallas_norm_ffn(x, lyr['ln2'], lyr['wi'], lyr['wo'],
                                    out_dtype=jnp.float32)

            # final norm + tied LM head (row t only)
            logits = pallas_norm_matmul(x, self.final_ln, self.lm_head,
                                        out_dtype=jnp.float32)
            logits = logits / jnp.float32(temperature)
            logits = jnp.where((jnp.arange(V)[None, :] == end_id)
                               & (t < min_length), -1e9, logits)
            next_tok = jnp.argmax(logits, axis=-1).astype(jnp.int32)   # greedy
            logp = jax.nn.log_softmax(logits, axis=-1)
            tok_lp = jnp.take_along_axis(logp, next_tok[:, None], axis=-1)[:, 0]
            next_tok = jnp.where(finished, jnp.int32(end_id), next_tok)
            tok_lp = jnp.where(finished, 0.0, tok_lp)
            newly = jnp.logical_and(jnp.logical_not(finished), next_tok == end_id)
            seq_len = jnp.where(newly, t + 1, seq_len)
            finished = jnp.logical_or(finished, newly)
            return ((next_tok, finished, seq_len, tuple(new_k), tuple(new_v)),
                    (next_tok, tok_lp))

        (_, _, seq_len, _, _), (toks, lps) = jax.lax.scan(
            step, (cur0, fin0, len0, k0, v0), jnp.arange(max_seq_len))

        out_ids = toks.T                                     # [Beff, max_seq_len]
        out_lp = lps.T
        cum_lp = out_lp.sum(axis=-1)

        results = [out_ids.reshape(B, beam_width, max_seq_len),
                   seq_len.reshape(B, beam_width)]
        if is_return_output_log_probs:
            results.append(out_lp.reshape(B, beam_width, max_seq_len))
        if is_return_cum_log_probs:
            results.append(cum_lp.reshape(B, beam_width))
        return results


# ------------------------------ smoke test ------------------------------------

if __name__ == "__main__":
    head_num, head_size = 2, 8
    d_model, mem_d_model, inter_size = 16, 16, 32
    num_layer, vocab_size = 2, 32
    start_id, end_id = 0, 1
    num_bucket, max_distance = 8, 16

    model = FTT5DecodingPallas(head_num, head_size, inter_size, mem_d_model,
                               d_model, num_layer, start_id, end_id, vocab_size,
                               q_scaling=1.0, num_bucket=num_bucket,
                               max_distance=max_distance,
                               tie_word_embeddings=True, seed=0)

    key = jax.random.PRNGKey(0)
    k1, _ = jax.random.split(key)
    batch, mem_seq = 2, 8
    mem_hidden_states = jax.random.normal(k1, (batch, mem_seq, mem_d_model),
                                          dtype=jnp.float32)
    mem_seq_len = jnp.array([mem_seq, mem_seq - 3], dtype=jnp.int32)

    results = model.forward(
        beam_width=1, max_seq_len=6, top_k=1, top_p=0.0,
        beam_search_diversity_rate=0.0, temperature=1.0, len_penalty=0.0,
        repetition_penalty=1.0, presence_penalty=0.0, min_length=1,
        random_seed=0, mem_hidden_states=mem_hidden_states,
        mem_seq_len=mem_seq_len, is_return_output_log_probs=True,
        is_return_cum_log_probs=True)

    results = [jax.block_until_ready(r) for r in results]
    print("KERNEL_OK")
</pallas_src>

<mosaic_0001>
module attributes {stable_mosaic.version = 11 : i64} {
  func.func @_matmul_kernel(%arg0: i32, %arg1: i32, %arg2: i32, %arg3: memref<16x16xbf16, #tpu.memory_space<vmem>>, %arg4: memref<16x16xbf16, #tpu.memory_space<vmem>>, %arg5: memref<16x16xbf16, #tpu.memory_space<vmem>>, %arg6: memref<16x16xf32, #tpu.memory_space<vmem>>) attributes {dimension_semantics = [#tpu.dimension_semantics<parallel>, #tpu.dimension_semantics<parallel>, #tpu.dimension_semantics<arbitrary>], iteration_bounds = array<i64: 1, 1, 1>, scalar_prefetch = 0 : i64, scratch_operands = 1 : i64, tpu.core_type = #tpu.core_type<tc>, window_params = [{transform_indices = @transform_0, window_bounds = array<i64: 16, 16>}, {transform_indices = @transform_1, window_bounds = array<i64: 16, 16>}, {transform_indices = @transform_2, window_bounds = array<i64: 16, 16>}]} {
    %c0_i32 = arith.constant 0 : i32
    %0 = arith.cmpi eq, %arg2, %c0_i32 : i32
    %1 = arith.extui %0 : i1 to i32
    %c0_i32_0 = arith.constant 0 : i32
    %2 = arith.cmpi ne, %1, %c0_i32_0 : i32
    scf.if %2 {
      %cst_10 = arith.constant 0.000000e+00 : f32
      %12 = vector.broadcast %cst_10 : f32 to vector<16x16xf32>
      %c0_11 = arith.constant 0 : index
      %c0_12 = arith.constant 0 : index
      %13 = vector.load %arg6[%c0_11, %c0_12] : memref<16x16xf32, #tpu.memory_space<vmem>>, vector<16x16xf32>
      tpu.vector_store %arg6[%c0_11, %c0_12], %12 {strides = array<i32>} : memref<16x16xf32, #tpu.memory_space<vmem>>, vector<16x16xf32>,
    } else {
    }
    %c0 = arith.constant 0 : index
    %c0_1 = arith.constant 0 : index
    %3 = vector.load %arg6[%c0, %c0_1] : memref<16x16xf32, #tpu.memory_space<vmem>>, vector<16x16xf32>
    %c0_2 = arith.constant 0 : index
    %c0_3 = arith.constant 0 : index
    %4 = vector.load %arg3[%c0_2, %c0_3] : memref<16x16xbf16, #tpu.memory_space<vmem>>, vector<16x16xbf16>
    %c0_4 = arith.constant 0 : index
    %c0_5 = arith.constant 0 : index
    %5 = vector.load %arg4[%c0_4, %c0_5] : memref<16x16xbf16, #tpu.memory_space<vmem>>, vector<16x16xbf16>
    %cst = arith.constant dense<0.000000e+00> : vector<16x16xf32>
    %6 = tpu.matmul %4, %5, %cst {dimension_numbers = #tpu.dot_dimension_numbers<[1], [0], [0], [1], [0, 0, 1, 1], [], []>} : vector<16x16xbf16>, vector<16x16xbf16>, vector<16x16xf32> -> vector<16x16xf32>
    %7 = arith.addf %3, %6 : vector<16x16xf32>
    %c0_6 = arith.constant 0 : index
    %c0_7 = arith.constant 0 : index
    %8 = vector.load %arg6[%c0_6, %c0_7] : memref<16x16xf32, #tpu.memory_space<vmem>>, vector<16x16xf32>
    tpu.vector_store %arg6[%c0_6, %c0_7], %7 {strides = array<i32>} : memref<16x16xf32, #tpu.memory_space<vmem>>, vector<16x16xf32>,
    %c0_i32_8 = arith.constant 0 : i32
    %9 = arith.cmpi eq, %arg2, %c0_i32_8 : i32
    %10 = arith.extui %9 : i1 to i32
    %c0_i32_9 = arith.constant 0 : i32
    %11 = arith.cmpi ne, %10, %c0_i32_9 : i32
    scf.if %11 {
      %c0_10 = arith.constant 0 : index
      %c0_11 = arith.constant 0 : index
      %12 = vector.load %arg6[%c0_10, %c0_11] : memref<16x16xf32, #tpu.memory_space<vmem>>, vector<16x16xf32>
      %13 = arith.truncf %12 : vector<16x16xf32> to vector<16x16xbf16>
      %c0_12 = arith.constant 0 : index
      %c0_13 = arith.constant 0 : index
      %14 = vector.load %arg5[%c0_12, %c0_13] : memref<16x16xbf16, #tpu.memory_space<vmem>>, vector<16x16xbf16>
      tpu.vector_store %arg5[%c0_12, %c0_13], %13 {strides = array<i32>} : memref<16x16xbf16, #tpu.memory_space<vmem>>, vector<16x16xbf16>,
    } else {
    }
    return
  }
  func.func @transform_0(%arg0: i32, %arg1: i32, %arg2: i32) -> (i32, i32) {
    %c0_i32 = arith.constant 0 : i32
    return %arg0, %arg2 : i32, i32
  }
  func.func @transform_1(%arg0: i32, %arg1: i32, %arg2: i32) -> (i32, i32) {
    %c0_i32 = arith.constant 0 : i32
    return %arg2, %arg1 : i32, i32
  }
  func.func @transform_2(%arg0: i32, %arg1: i32, %arg2: i32) -> (i32, i32) {
    %c0_i32 = arith.constant 0 : i32
    return %arg0, %arg1 : i32, i32
  }
}

</mosaic_0001>

<bundles_post_ra>
// kernel: tpu_custom_call.1
= control target key start
LH: loop header
LB: loop body
LE: loop exit
PB: predicated region body
PF: predicated region fallthrough
CT: control target
= control target key end

     0   :  { %7 = vsyncpa [#allocation4], 0  ;;  %s316_s0 = inlined_call_operand.hbm [shape: bf16[16,16], index: 0, kind: input, shape index: {}]   ;;  %s317_s1 = inlined_call_operand.hbm [shape: bf16[16,16], index: 1, kind: input, shape index: {}]   ;;  %s318_s2 = inlined_call_operand.hbm [shape: bf16[16,16], index: 2, kind: output, shape index: {}]  }
   0x1   :  { %8 = vsyncpa [#allocation7], 0 }
   0x2   :  { %9 = vsyncpa [#allocation5], 0  ;;  %s244_s9 = smov [#allocation3]   ;;  %s172_s13 = scalar_lea.hbm %s316_s0, 128 }
   0x3   :  { %s15_s10 = sshll.u32 %s244_s9, 4  ;;  %p173_p0 = scmp.ne.s32.totalorder %s316_s0, %s172_s13  ;;  %s16_s10 = int_to_ptr.vmem [resolvable:$true] %s15_s10 }
   0x4   :  { %p176_p1 = scmp.lt.u32.totalorder %s172_s13, %s316_s0 }
   0x6   :  { %p178_p2 = pnand %p176_p1, %p173_p0 }
   0x8   :  { %181 = shalt.err (!%p178_p2)
}
   0x9   :  { %s182_s18 = scalar_lea.vmem %s16_s10, 128  ;;  %p187_p4 = scmp.lt.s32.totalorder %s16_s10, %s16_s10 }
   0xa   :  { %p183_p3 = scmp.ne.s32.totalorder %s16_s10, %s182_s18  ;;  %p188_p5 = scmp.lt.s32.totalorder %s182_s18, %s182_s18 }
   0xc   :  { %p189_p6 = por %p188_p5, %p187_p4 }
   0xe   :  { %p190_p7 = pnand %p189_p6, %p183_p3 }
  0x10   :  { %193 = shalt.err (!%p190_p7)
}
  0x11   :  { %s245_s19 = smov 64   ;;  %s246_s20 = smov 4  }
  0x12   :  { %21 = dma.hbm_to_vmem [thread:$0]  %s316_s0, 128, %s16_s10, [#allocation4], %s245_s19, %s245_s19, %s246_s20  }
  0x13   :  { %s247_s23 = smov [#allocation6]   ;;  %s194_s27 = scalar_lea.hbm %s317_s1, 128 }
  0x14   :  { %s27_s24 = sshll.u32 %s247_s23, 4  ;;  %p195_p8 = scmp.ne.s32.totalorder %s317_s1, %s194_s27  ;;  %s28_s24 = int_to_ptr.vmem [resolvable:$true] %s27_s24 }
  0x15   :  { %p198_p9 = scmp.lt.u32.totalorder %s194_s27, %s317_s1 }
  0x17   :  { %p200_p10 = pnand %p198_p9, %p195_p8 }
  0x19   :  { %203 = shalt.err (!%p200_p10)
}
  0x1a   :  { %s204_s4 = scalar_lea.vmem %s28_s24, 128  ;;  %p209_p12 = scmp.lt.s32.totalorder %s28_s24, %s28_s24 }
  0x1b   :  { %p205_p11 = scmp.ne.s32.totalorder %s28_s24, %s204_s4  ;;  %p210_p13 = scmp.lt.s32.totalorder %s204_s4, %s204_s4 }
  0x1d   :  { %p211_p0 = por %p210_p13, %p209_p12 }
  0x1f   :  { %p212_p1 = pnand %p211_p0, %p205_p11 }
  0x21   :  { %215 = shalt.err (!%p212_p1)
}
  0x22   :  { %33 = dma.hbm_to_vmem [thread:$0]  %s317_s1, 128, %s28_s24, [#allocation7], %s245_s19, %s245_s19, %s246_s20  }
  0x23   :  { %238 = dma.done.wait [#allocation4], 128  }
  0x24   :  { %239 = vsyncadd [#allocation4], 4294967168 }
  0x25   :  { %240 = dma.done.wait [#allocation7], 128  }
  0x26   :  { %241 = vsyncadd [#allocation7], 4294967168  ;;  %vm45_vm0 = vcmask 130048   ;;  %v248_v0 = vmov 0.0   ;;  %vm249_vm1 = vmmov 0   ;;  %v170_v1 = vld [vmem:[#allocation6] sm:$0xff]  }
  0x27   :  { %157 = vmatprep.subr.bf16.mxu0 %v248_v0  ;;  %159 = vmatprep.mubr.msk.bf16.mxu0 %vm249_vm1, %v248_v0  ;;  %46 = vst.msk [vmem:[#allocation2] sm:$0xff] %vm45_vm0, %v248_v0  ;;  %47 = vst.msk [vmem:[#allocation2 + $0x8] sm:$0xff] %vm45_vm0, %v248_v0  ;;  %v171_v2 = vld [vmem:[#allocation3] sm:$0xff]   ;;  %vm127_vm2 = vcmask 125952   ;;  %s250_s1 = smov [#allocation8]  }
  0x28   :  { %158 = vmatpush3.bf16.msra.mxu0 %v170_v1  ;;  %s135_s6 = sshll.u32 %s250_s1, 4  ;;  %s136_s6 = int_to_ptr.vmem [resolvable:$true] %s135_s6 }
  0x29   :  { %s216_s7 = scalar_lea.vmem %s136_s6, 128  ;;  %p221_p3 = scmp.lt.s32.totalorder %s136_s6, %s136_s6 }
  0x2a   :  { %p217_p2 = scmp.ne.s32.totalorder %s136_s6, %s216_s7  ;;  %p222_p4 = scmp.lt.s32.totalorder %s216_s7, %s216_s7 }
  0x2b   :  { %160 = vmatmul.mubr.msk.bf16.vlgmr.msra.gmra.mrb[0].mxu0 %vm45_vm0, %v171_v2 }
  0x2c   :  { %p223_p5 = por %p222_p4, %p221_p3 }
  0x2e   :  { %v48_v3 = vld [vmem:[#allocation2] sm:$0xff]  ;;  %v49_v5 = vld [vmem:[#allocation2 + $0x8] sm:$0xff]  ;;  %p224_p6 = pnand %p223_p5, %p217_p2 }
  0xfe   :  { %v103_v4 = vpop.f32.mrb[0].mxu0 }
  0xff   :  { %v110_v6 = vadd.f32 %v103_v4, %v48_v3  ;;  %v161_v7 = vpop.f32.mrb[1].mxu0 }
 0x100   :  { %v106_v8 = vpop.f32.mrb[2].mxu0 }
 0x101   :  { %112 = vst.msk [vmem:[#allocation2] sm:$0xff] %vm45_vm0, %v110_v6  ;;  %v111_v9 = vadd.f32 %v106_v8, %v49_v5  ;;  %v162_v10 = vpop.f32.mrb[3].mxu0 }
 0x103   :  { %113 = vst.msk [vmem:[#allocation2 + $0x8] sm:$0xff] %vm45_vm0, %v111_v9 }
 0x108   :  { %v117_v11 = vld [vmem:[#allocation2] sm:$0xff] }
 0x109   :  { %v153_v12 = vpack.c.bf16 %v117_v11, %v117_v11 }
 0x10a   :  { %v118_v13 = vld [vmem:[#allocation2 + $0x8] sm:$0xff] }
 0x10b   :  { %v154_v14 = vpack.c.bf16 %v118_v13, %v118_v13  ;;  %128 = vst.msk [vmem:[#allocation8] sm:$0xf] %vm127_vm2, %v153_v12 }
 0x10d   :  { %129 = vst.msk [vmem:[#allocation8 + $0x4] sm:$0xf] %vm127_vm2, %v154_v14 }
 0x10e   :  { %227 = shalt.err (!%p224_p6)
}
 0x10f   :  { %s228_s10 = scalar_lea.hbm %s318_s2, 128 }
 0x110   :  { %p229_p7 = scmp.ne.s32.totalorder %s318_s2, %s228_s10  ;;  %p232_p8 = scmp.lt.u32.totalorder %s228_s10, %s318_s2 }
 0x112   :  { %p234_p9 = pnand %p232_p8, %p229_p7 }
 0x114   :  { %237 = shalt.err (!%p234_p9)
}
 0x115   :  { %141 = dma.vmem_to_hbm [thread:$0]  %s136_s6, 128, %s318_s2, [#allocation5], %s245_s19, %s245_s19, %s246_s20  }
 0x116   :  { %242 = dma.done.wait [#allocation5], 128  }
 0x117   :  { %243 = vsyncadd [#allocation5], 4294967168 }
 0x118   :  { %145 = vsyncpa [#allocation4], 1 }
 0x119   :  { %146 = vsyncpa [#allocation7], 1 }
 0x11a   :  { %147 = vsyncpa [#allocation5], 1 }

</bundles_post_ra>
